<compile_context>
chip_gen: v7x
topology: tpu7x:2x2x1
jax: 0.10.0
libtpu: 0.0.40
codegen_flags: <defaults>
</compile_context>

<pallas_src>
import jax
import jax.numpy as jnp
from jax.experimental import pallas as pl
from jax.experimental.pallas import tpu as pltpu


def _largest_divisor_leq(n, cap):
    for d in range(min(n, cap), 0, -1):
        if n % d == 0:
            return d
    return 1


def _pick_l_tile(L, cap, align=8):
    """Length tile: divides L and is sublane-aligned, unless it is the full length."""
    if L <= cap:
        return L
    for d in range(min(L, cap), align - 1, -1):
        if L % d == 0 and d % align == 0:
            return d
    return L


def _pick_b_tile(B, TL, m_cap):
    """Batch tile folded with TL into the MXU M dimension."""
    if TL % 8 != 0:
        # Collapsing (TB, TL) with an unaligned TL crosses (8,128) tiles and would force a
        # VMEM relayout copy every grid step; keep TB == 1 so the collapse is a free squeeze.
        return 1
    cap = max(1, m_cap // TL)
    if B >= 2:
        cap = min(cap, B // 2)  # >= 2 "parallel" grid steps so both v7x TensorCores get work
    return _largest_divisor_leq(B, max(cap, 1))


def _vmem_limit_bytes(TB, TL, Kc, Hn, in_bytes, out_bytes):
    x_blk = 2 * TB * TL * Kc * in_bytes       # double-buffered im2col tile
    w_buf = Kc * Hn * in_bytes                # single-buffered weight (pl.Buffered(1))
    b_buf = Hn * 4                            # single-buffered bias
    o_blk = 2 * TB * TL * Hn * out_bytes      # double-buffered activation tile
    h_blk = 2 * TB * Hn * out_bytes           # pooled-h block
    y_tmp = TB * TL * Hn * 4                  # f32 matmul result / epilogue
    needed = x_blk + w_buf + b_buf + o_blk + h_blk + y_tmp + (8 << 20)
    # Clamp to 64 MiB = v7x per-TensorCore physical VMEM (v5e/v6e have 128 MiB).
    return int(min(max(needed, 32 << 20), 64 << 20))


def _make_kernel(TB, TL, Kc, Hn):
    def kernel(x_ref, w_ref, b_ref, out_ref, h_ref):
        li = pl.program_id(1)

        # (TB, TL, Kc) -> (TB*TL, Kc): batch+length folded into the MXU M dimension.
        # Free: either TL % 8 == 0 or TB == 1 (enforced by the wrapper tiling).
        x = x_ref[...].reshape(TB * TL, Kc)
        # Single wide matmul over all taps and all kernel sizes; f32 accumulation.
        y = jnp.dot(x, w_ref[...], preferred_element_type=jnp.float32)      # (TB*TL, Hn)
        y = jnp.maximum(y + b_ref[...], 0.0)                                # bias + ReLU (f32)
        y3 = y.reshape(TB, TL, Hn)

        # Store exactly Hn channels (no lane padding -> no post-kernel strip pass).
        out_ref[...] = y3.astype(out_ref.dtype)

        # Global max-pool over L as a running max across the "arbitrary" length axis.
        tile_max = jnp.max(y3, axis=1, keepdims=True)                       # (TB, 1, Hn)

        @pl.when(li == 0)
        def _init():
            h_ref[...] = tile_max.astype(h_ref.dtype)

        @pl.when(li != 0)
        def _update():
            h_ref[...] = jnp.maximum(h_ref[...], tile_max.astype(h_ref.dtype))

    return kernel


def cnn_encoder(seqs, lengths, weights, biases, kernel_sizes, hidden_size,
                compute_dtype=jnp.float32, out_dtype=None, m_tile_cap=1024):
    """seqs: (B, L, C_in).
    weights[i]: PyTorch Conv1d layout (hidden, input, k_i); biases[i]: (hidden,).
    `lengths` is unused by the reference forward (max-pool runs over the full length).
    compute_dtype=bf16 halves x/weight DMA bytes (recommended on v5e/v6e/v7x at production
    sizes); out_dtype=bf16 additionally halves the dominant activation write.
    """
    del lengths  # matches the PyTorch forward, which ignores lengths
    B, L, C_in = seqs.shape
    H = hidden_size
    n_k = len(kernel_sizes)
    assert all(k % 2 == 1 for k in kernel_sizes), "odd kernel sizes required (same-length outputs)"

    Hn = H * n_k                           # output channels stored exactly (no Hp padding)
    pad_max = max((k - 1) // 2 for k in kernel_sizes)
    K_f = 2 * pad_max + 1                  # fused tap window (centered offsets)
    Kc = K_f * C_in                        # fused contraction length
    out_dtype = seqs.dtype if out_dtype is None else out_dtype

    # ---- fused weight: all kernel sizes + all taps in one (Kc, Hn) operand ----
    w_full = jnp.zeros((K_f, C_in, Hn), jnp.float32)
    for idx, k in enumerate(kernel_sizes):
        p = (k - 1) // 2
        w_kio = jnp.transpose(weights[idx], (2, 1, 0))                      # (k, C_in, H)
        w_full = w_full.at[pad_max - p:pad_max - p + k, :, idx * H:(idx + 1) * H].set(w_kio)
    w_flat = w_full.reshape(Kc, Hn).astype(compute_dtype)
    b_full = jnp.concatenate(biases).reshape(1, Hn).astype(jnp.float32)     # epilogue stays f32

    # ---- im2col in the wrapper: cast FIRST, then slice+concat (halves the im2col pass
    #      in bf16 mode); length tiles then need no halo inside the kernel ----
    x_src = seqs if seqs.dtype == compute_dtype else seqs.astype(compute_dtype)
    x_pad = jnp.pad(x_src, ((0, 0), (pad_max, pad_max), (0, 0)))
    x_col = jnp.concatenate([x_pad[:, t:t + L, :] for t in range(K_f)], axis=-1)  # (B, L, Kc)

    # ---- tiling: fold batch+length into the matmul M dim; keep blocks VMEM-bounded ----
    TL = _pick_l_tile(L, m_tile_cap)                  # length tile ("arbitrary", reduction)
    TB = _pick_b_tile(B, TL, m_tile_cap)              # batch tile ("parallel")
    grid = (B // TB, L // TL)
    vmem_limit = _vmem_limit_bytes(TB, TL, Kc, Hn,
                                   jnp.dtype(compute_dtype).itemsize,
                                   jnp.dtype(out_dtype).itemsize)

    kernel = _make_kernel(TB, TL, Kc, Hn)

    out_full, h_full = pl.pallas_call(
        kernel,
        out_shape=(
            jax.ShapeDtypeStruct((B, L, Hn), out_dtype),     # activation map (NLC)
            jax.ShapeDtypeStruct((B, 1, Hn), out_dtype),     # pooled h
        ),
        grid_spec=pltpu.PrefetchScalarGridSpec(
            num_scalar_prefetch=0,
            grid=grid,
            in_specs=[
                pl.BlockSpec((TB, TL, Kc), lambda bi, li: (bi, li, 0)),
                # Grid-invariant operands: single-buffered to save VMEM headroom.
                pl.BlockSpec((Kc, Hn), lambda bi, li: (0, 0),
                             pipeline_mode=pl.Buffered(1)),
                pl.BlockSpec((1, Hn), lambda bi, li: (0, 0),
                             pipeline_mode=pl.Buffered(1)),
            ],
            out_specs=(
                pl.BlockSpec((TB, TL, Hn), lambda bi, li: (bi, li, 0)),
                pl.BlockSpec((TB, 1, Hn), lambda bi, li: (bi, 0, 0)),   # resident across li
            ),
        ),
        compiler_params=pltpu.CompilerParams(
            dimension_semantics=("parallel", "arbitrary"),
            vmem_limit_bytes=vmem_limit),
    )(x_col, w_flat, b_full)

    h = h_full[:, 0, :]     # (B, Hn) — tiny tensor, cheap squeeze; no strip of the big output
    return h, out_full


def _reference(seqs, weights, biases, kernel_sizes, hidden_size):
    """Pure-JAX reference reproducing the PyTorch forward (f32)."""
    B, L, C = seqs.shape
    outs = []
    for idx, k in enumerate(kernel_sizes):
        p = (k - 1) // 2
        xp = jnp.pad(seqs, ((0, 0), (p, p), (0, 0)))
        w = jnp.transpose(weights[idx], (2, 1, 0))               # (k, C, H)
        acc = jnp.zeros((B, L, hidden_size), jnp.float32)
        for j in range(k):
            acc = acc + jnp.einsum("blc,ch->blh", xp[:, j:j + L, :], w[j])
        outs.append(acc + biases[idx][None, None, :])
    out = jnp.maximum(jnp.concatenate(outs, axis=-1), 0.0)
    h = jnp.max(out, axis=1)
    return h, out


if __name__ == "__main__":
    key = jax.random.PRNGKey(0)

    input_size = 4
    hidden_size = 32
    kernel_sizes = [3, 5]   # odd sizes so all conv outputs share length L (required for cat)
    Hn = hidden_size * len(kernel_sizes)

    k_p, k_x1, k_x2 = jax.random.split(key, 3)

    # deterministic parameters in PyTorch Conv1d layout (out, in, k)
    pkeys = jax.random.split(k_p, 2 * len(kernel_sizes))
    weights, biases = [], []
    for i, ks in enumerate(kernel_sizes):
        weights.append(0.1 * jax.random.normal(pkeys[2 * i],
                                               (hidden_size, input_size, ks), jnp.float32))
        biases.append(0.1 * jax.random.normal(pkeys[2 * i + 1], (hidden_size,), jnp.float32))

    # --- case 1: B=2, L=8 (single length tile), f32 path ---
    B, L = 2, 8
    seqs = jax.random.normal(k_x1, (B, L, input_size), dtype=jnp.float32)
    lengths = jnp.full((B,), L, dtype=jnp.int32)   # unused by the forward semantics

    h, output = cnn_encoder(seqs, lengths, weights, biases, kernel_sizes, hidden_size)
    jax.block_until_ready((h, output))
    h_exp, out_exp = _reference(seqs, weights, biases, kernel_sizes, hidden_size)
    assert h.shape == (B, Hn)
    assert output.shape == (B, L, Hn)
    assert jnp.allclose(h, h_exp, atol=1e-5)
    assert jnp.allclose(output, out_exp, atol=1e-5)

    # bf16 MXU inputs + bf16 activation write (halves the dominant HBM streams; f32 accumulate)
    h16, out16 = cnn_encoder(seqs, lengths, weights, biases, kernel_sizes, hidden_size,
                             compute_dtype=jnp.bfloat16, out_dtype=jnp.bfloat16)
    jax.block_until_ready((h16, out16))
    assert out16.dtype == jnp.bfloat16
    assert jnp.allclose(h16.astype(jnp.float32), h_exp, atol=3e-2)
    assert jnp.allclose(out16.astype(jnp.float32), out_exp, atol=3e-2)

    # --- case 2: B=4, L=16 with a small M-tile cap -> 2 length tiles per batch row,
    #     exercising the running-max accumulator across the "arbitrary" axis ---
    B2, L2 = 4, 16
    seqs2 = jax.random.normal(k_x2, (B2, L2, input_size), dtype=jnp.float32)
    lengths2 = jnp.full((B2,), L2, dtype=jnp.int32)
    h2, out2 = cnn_encoder(seqs2, lengths2, weights, biases, kernel_sizes, hidden_size,
                           m_tile_cap=8)
    jax.block_until_ready((h2, out2))
    h2_exp, out2_exp = _reference(seqs2, weights, biases, kernel_sizes, hidden_size)
    assert jnp.allclose(h2, h2_exp, atol=1e-5)
    assert jnp.allclose(out2, out2_exp, atol=1e-5)

    print("KERNEL_OK")
</pallas_src>

<mosaic_0001>
module attributes {stable_mosaic.version = 11 : i64} {
  func.func @kernel(%arg0: i32, %arg1: i32, %arg2: memref<1x8x20xf32, #tpu.memory_space<vmem>>, %arg3: memref<20x64xf32, #tpu.memory_space<vmem>>, %arg4: memref<1x64xf32, #tpu.memory_space<vmem>>, %arg5: memref<1x8x64xf32, #tpu.memory_space<vmem>>, %arg6: memref<1x1x64xf32, #tpu.memory_space<vmem>>) attributes {dimension_semantics = [#tpu.dimension_semantics<parallel>, #tpu.dimension_semantics<arbitrary>], iteration_bounds = array<i64: 2, 1>, scalar_prefetch = 0 : i64, scratch_operands = 0 : i64, tpu.core_type = #tpu.core_type<tc>, window_params = [{transform_indices = @transform_0, window_bounds = array<i64: 1, 8, 20>}, {pipeline_mode = #tpu.pipeline_mode<synchronous>, transform_indices = @transform_1, window_bounds = array<i64: 20, 64>}, {pipeline_mode = #tpu.pipeline_mode<synchronous>, transform_indices = @transform_2, window_bounds = array<i64: 1, 64>}, {transform_indices = @transform_3, window_bounds = array<i64: 1, 8, 64>}, {transform_indices = @transform_4, window_bounds = array<i64: 1, 1, 64>}]} {
    %c0 = arith.constant 0 : index
    %c0_0 = arith.constant 0 : index
    %c0_1 = arith.constant 0 : index
    %0 = vector.load %arg2[%c0, %c0_0, %c0_1] : memref<1x8x20xf32, #tpu.memory_space<vmem>>, vector<1x8x20xf32>
    %1 = vector.shape_cast %0 : vector<1x8x20xf32> to vector<8x20xf32>
    %c0_2 = arith.constant 0 : index
    %c0_3 = arith.constant 0 : index
    %2 = vector.load %arg3[%c0_2, %c0_3] : memref<20x64xf32, #tpu.memory_space<vmem>>, vector<20x64xf32>
    %cst = arith.constant dense<0.000000e+00> : vector<8x64xf32>
    %3 = tpu.matmul %1, %2, %cst {dimension_numbers = #tpu.dot_dimension_numbers<[1], [0], [0], [1], [0, 0, 1, 1], [], []>} : vector<8x20xf32>, vector<20x64xf32>, vector<8x64xf32> -> vector<8x64xf32>
    %c0_4 = arith.constant 0 : index
    %c0_5 = arith.constant 0 : index
    %4 = vector.load %arg4[%c0_4, %c0_5] : memref<1x64xf32, #tpu.memory_space<vmem>>, vector<1x64xf32>
    %5 = vector.broadcast %4 : vector<1x64xf32> to vector<8x64xf32>
    %6 = arith.addf %3, %5 : vector<8x64xf32>
    %cst_6 = arith.constant 0.000000e+00 : f32
    %7 = vector.broadcast %cst_6 : f32 to vector<8x64xf32>
    %8 = arith.maximumf %6, %7 : vector<8x64xf32>
    %9 = vector.shape_cast %8 : vector<8x64xf32> to vector<1x8x64xf32>
    %c0_7 = arith.constant 0 : index
    %c0_8 = arith.constant 0 : index
    %c0_9 = arith.constant 0 : index
    %10 = vector.load %arg5[%c0_7, %c0_8, %c0_9] : memref<1x8x64xf32, #tpu.memory_space<vmem>>, vector<1x8x64xf32>
    tpu.vector_store %arg5[%c0_7, %c0_8, %c0_9], %9 {strides = array<i32>} : memref<1x8x64xf32, #tpu.memory_space<vmem>>, vector<1x8x64xf32>,
    %cst_10 = arith.constant dense<0xFF800000> : vector<1x64xf32>
    %11 = vector.multi_reduction <maximumf>, %9, %cst_10 [1] : vector<1x8x64xf32> to vector<1x64xf32>
    %12 = vector.shape_cast %11 : vector<1x64xf32> to vector<1x1x64xf32>
    %c0_i32 = arith.constant 0 : i32
    %13 = arith.cmpi eq, %arg1, %c0_i32 : i32
    %14 = arith.extui %13 : i1 to i32
    %c0_i32_11 = arith.constant 0 : i32
    %15 = arith.cmpi ne, %14, %c0_i32_11 : i32
    scf.if %15 {
      %c0_14 = arith.constant 0 : index
      %c0_15 = arith.constant 0 : index
      %c0_16 = arith.constant 0 : index
      %19 = vector.load %arg6[%c0_14, %c0_15, %c0_16] : memref<1x1x64xf32, #tpu.memory_space<vmem>>, vector<1x1x64xf32>
      tpu.vector_store %arg6[%c0_14, %c0_15, %c0_16], %12 {strides = array<i32>} : memref<1x1x64xf32, #tpu.memory_space<vmem>>, vector<1x1x64xf32>,
    } else {
    }
    %c0_i32_12 = arith.constant 0 : i32
    %16 = arith.cmpi ne, %arg1, %c0_i32_12 : i32
    %17 = arith.extui %16 : i1 to i32
    %c0_i32_13 = arith.constant 0 : i32
    %18 = arith.cmpi ne, %17, %c0_i32_13 : i32
    scf.if %18 {
      %c0_14 = arith.constant 0 : index
      %c0_15 = arith.constant 0 : index
      %c0_16 = arith.constant 0 : index
      %19 = vector.load %arg6[%c0_14, %c0_15, %c0_16] : memref<1x1x64xf32, #tpu.memory_space<vmem>>, vector<1x1x64xf32>
      %20 = arith.maximumf %19, %12 : vector<1x1x64xf32>
      %c0_17 = arith.constant 0 : index
      %c0_18 = arith.constant 0 : index
      %c0_19 = arith.constant 0 : index
      %21 = vector.load %arg6[%c0_17, %c0_18, %c0_19] : memref<1x1x64xf32, #tpu.memory_space<vmem>>, vector<1x1x64xf32>
      tpu.vector_store %arg6[%c0_17, %c0_18, %c0_19], %20 {strides = array<i32>} : memref<1x1x64xf32, #tpu.memory_space<vmem>>, vector<1x1x64xf32>,
    } else {
    }
    return
  }
  func.func @transform_0(%arg0: i32, %arg1: i32) -> (i32, i32, i32) {
    %c0_i32 = arith.constant 0 : i32
    %c0_i32_0 = arith.constant 0 : i32
    return %arg0, %arg1, %c0_i32 : i32, i32, i32
  }
  func.func @transform_1(%arg0: i32, %arg1: i32) -> (i32, i32) {
    %c0_i32 = arith.constant 0 : i32
    %c0_i32_0 = arith.constant 0 : i32
    %c0_i32_1 = arith.constant 0 : i32
    return %c0_i32, %c0_i32_0 : i32, i32
  }
  func.func @transform_2(%arg0: i32, %arg1: i32) -> (i32, i32) {
    %c0_i32 = arith.constant 0 : i32
    %c0_i32_0 = arith.constant 0 : i32
    %c0_i32_1 = arith.constant 0 : i32
    return %c0_i32, %c0_i32_0 : i32, i32
  }
  func.func @transform_3(%arg0: i32, %arg1: i32) -> (i32, i32, i32) {
    %c0_i32 = arith.constant 0 : i32
    %c0_i32_0 = arith.constant 0 : i32
    return %arg0, %arg1, %c0_i32 : i32, i32, i32
  }
  func.func @transform_4(%arg0: i32, %arg1: i32) -> (i32, i32, i32) {
    %c0_i32 = arith.constant 0 : i32
    %c0_i32_0 = arith.constant 0 : i32
    %c0_i32_1 = arith.constant 0 : i32
    return %arg0, %c0_i32, %c0_i32_0 : i32, i32, i32
  }
}

</mosaic_0001>

<bundles_post_ra>
// kernel: tpu_custom_call.1
= control target key start
LH: loop header
LB: loop body
LE: loop exit
PB: predicated region body
PF: predicated region fallthrough
CT: control target
= control target key end

     0   :  { %10 = vsyncpa [#allocation3], 0  ;;  %s1096_s0 = inlined_call_operand.hbm [shape: f32[2,8,20], index: 0, kind: input, shape index: {}]   ;;  %s1097_s1 = inlined_call_operand.hbm [shape: f32[20,64], index: 1, kind: input, shape index: {}]   ;;  %s1098_s2 = inlined_call_operand.vmem [shape: f32[1,64], index: 2, kind: input, shape index: {}]   ;;  %s1099_s3 = inlined_call_operand.hbm [shape: f32[2,8,64], index: 3, kind: output, shape index: {0}]   ;;  %s1100_s4 = inlined_call_operand.hbm [shape: f32[2,1,64], index: 4, kind: output, shape index: {1}]  }
   0x1   :  { %12 = vsyncpa [#allocation3 + $0x1], 0 }
   0x2   :  { %13 = vsyncpa [#allocation6], 0 }
   0x3   :  { %14 = vsyncpa [#allocation4], 0 }
   0x4   :  { %16 = vsyncpa [#allocation4 + $0x1], 0 }
   0x5   :  { %17 = vsyncpa [#allocation9], 0 }
   0x6   :  { %19 = vsyncpa [#allocation9 + $0x1], 0  ;;  %s848_s15 = smov 0   ;;  %s850_s16 = smov 0  }
   0x7   :  { %s852_s17 = smov 0   ;;  %s854_s18 = smov 0  }
   0x8   :  { %s856_s19 = smov 0   ;;  %s858_s20 = smov 0  }
   0x9 LB: > { %s518_s21 = sadd.s32 4294967295, %s812_s20   ;;  %s519_s22 = sadd.s32 4294967294, %s812_s20   ;;  %s812_s20 = sphi %s858_s20, %s25_s20   ;;  %s808_s19 = sphi %s856_s19, %s1124_s19   ;;  %s804_s18 = sphi %s854_s18, %s1123_s18   ;;  %s800_s17 = sphi %s852_s17, %s1122_s17   ;;  %s796_s16 = sphi %s850_s16, %s1121_s16   ;;  %s792_s15 = sphi %s848_s15, %s1120_s15  }
   0xa   : > { %p59_p0 = scmp.ne.s32.totalorder %s796_s16, %s792_s15  ;;  %p882_p1 = scmp.eq.s32.totalorder %s518_s21, 0 }
   0xb   : > { %p886_p2 = scmp.eq.s32.totalorder %s518_s21, 1  ;;  %p133_p3 = scmp.eq.s32.totalorder %s519_s22, 1 }
   0xc   : > { %s1105_s23 = scalar_select %p882_p1, 1, 0 }
   0xd   : > { %s1106_s24 = scalar_select %p886_p2, 1, 0 }
   0xe   : > { %p892_p4 = por %p882_p1, %p59_p0  ;;  %p520_p5 = scmp.ge.s32.totalorder %s812_s20, 1 }
   0xf   : > { %p897_p6 = por %p133_p3, %p59_p0  ;;  %p166_p7 = scmp.lt.s32.totalorder %s812_s20, 3 }
  0x10   : > { %s1107_s25 = scalar_select %p892_p4, 1, 0 }
  0x11   : > { %s1108_s26 = scalar_select %p897_p6, 1, 0 }
  0x12   : > { %p902_p8 = pnand %p520_p5, %p166_p7  ;;  %s814_s28 = smov [#allocation5]  }
  0x13   : > { %s178_s29 = sshll.u32 %s814_s28, 4  ;;  %s37_s5 = sadd.s32 1, %s808_s19  ;;  %s179_s29 = int_to_ptr.vmem [resolvable:$true] %s178_s29 }
  0x14   : > { %s1109_s27 = scalar_select %p902_p8, 1, 0 }
  0x15   : > { %p563_p9 = pneg %p902_p8  ;;  %s636_s8 = scalar_lea.hbm %s1097_s1, 384 }
  0x16   : > { %p637_p12 = scmp.ne.s32.totalorder %s1097_s1, %s636_s8  ;;  %p643_p5 = scmp.lt.u32.totalorder %s636_s8, %s1097_s1 }
  0x17   : > { %p911_p11 = pnand %p563_p9, %p882_p1 }
  0x19   : > { %p638_p13 = pneg %p911_p11 }
  0x1b   : > { %p639_p0 = pnand %p638_p13, %p637_p12 }
  0x1d   : > { %p640_p3 = pneg %p639_p0 }
  0x1f   : > { %p645_p7 = pnand %p643_p5, %p640_p3 }
  0x21   : > { %648 = shalt.err (!%p645_p7)
}
  0x22   : > { %s649_s13 = scalar_lea.vmem %s179_s29, 384  ;;  %p657_p1 = scmp.lt.s32.totalorder %s179_s29, %s179_s29 }
  0x23   : > { %p650_p9 = scmp.ne.s32.totalorder %s179_s29, %s649_s13  ;;  %p658_p4 = scmp.lt.s32.totalorder %s649_s13, %s649_s13 }
  0x25   : > { %p652_p10 = pnand %p650_p9, %p638_p13  ;;  %p659_p8 = por %p658_p4, %p657_p1 }
  0x27   : > { %p653_p6 = pneg %p652_p10 }
  0x29   : > { %p660_p2 = pnand %p659_p8, %p653_p6 }
  0x2b   : > { %663 = shalt.err (!%p660_p2)
}
  0x2c   : > { %s815_s14 = smov 128   ;;  %s816_s21 = smov 8  }
  0x2d   : > { %566 = dma.hbm_to_vmem [thread:$0]  (!%p911_p11), %s1097_s1, 384, %s179_s29, [#allocation6], %s815_s14, %s815_s14, %s816_s21  }
  0x2e   : > { %p39_p1 = scmp.ge.s32.totalorder %s37_s5, 2  ;;  %s46_s6 = sadd.s32 1, %s800_s17 }
  0x2f   : > { %p53_p2 = scmp.ne.s32.totalorder %s800_s17, %s796_s16  ;;  %p54_p4 = scmp.eq.s32.totalorder %s812_s20, 0 }
  0x30   : > { %s1126_s5 = smov (%p39_p1, %s37_s5), 0  ;;  %p1112_p8 = scmp.ne.s32.totalorder %s1106_s24, 0 }
  0x31   : > { %p938_p6 = por %p54_p4, %p53_p2  ;;  %s41_s30 = ssub.s32 %s808_s19, %s1126_s5 }
  0x32   : > { %p944_p10 = por %p1112_p8, %p53_p2  ;;  %p579_p12 = scmp.lt.s32.totalorder %s812_s20, 2 }
  0x33   : > { %p44_p11 = scmp.eq.s32.totalorder %s41_s30, 0  ;;  %s195_s29 = sand.u32 1, %s800_s17  }
  0x34   : > { %s523_s9 = sshll.u32 %s195_s29, 3  ;;  %s524_s11 = sshll.u32 %s808_s19, 7 }
  0x35   : > { %s953_s10 = scalar_select %p44_p11, %s800_s17, %s46_s6  }
  0x36   : > { %s959_s14 = scalar_lea.hbm %s1096_s0, %s524_s11  ;;  %s199_s24 = scalar_lea.vmem [#allocation2], %s523_s9 }
  0x37   : > { %s207_s21 = sshll.u32 %s199_s24, 4  ;;  %p965_p13 = pnand %p579_p12, %p938_p6  ;;  %s961_s21 = int_to_ptr.vmem [resolvable:$true] %s207_s21 }
  0x38   : > { %s196_s28 = scalar_lea.sflag [#allocation3], %s195_s29  ;;  %s664_s6 = scalar_lea.hbm %s959_s14, 128 }
  0x39   : > { %p665_p0 = scmp.ne.s32.totalorder %s959_s14, %s664_s6  ;;  %p666_p3 = pneg %p965_p13 }
  0x3a   : > { %s669_s11 = scalar_lea.hbm %s1096_s0, 256  ;;  %p670_p9 = scmp.lt.u32.totalorder %s959_s14, %s1096_s0 }
  0x3b   : > { %p667_p5 = pnand %p666_p3, %p665_p0  ;;  %p671_p1 = scmp.lt.u32.totalorder %s669_s11, %s664_s6 }
  0x3c   : > { %p673_p4 = scmp.lt.u32.totalorder %s664_s6, %s959_s14 }
  0x3d   : > { %p668_p7 = pneg %p667_p5  ;;  %p672_p2 = por %p671_p1, %p670_p9 }
  0x3f   : > { %p674_p6 = por %p673_p4, %p672_p2 }
  0x41   : > { %p675_p8 = pnand %p674_p6, %p668_p7 }
  0x43   : > { %678 = shalt.err (!%p675_p8)
}
  0x44   : > { %s679_s29 = scalar_lea.vmem %s961_s21, 128  ;;  %s817_s13 = smov [#allocation2]  }
  0x45   : > { %p680_p12 = scmp.ne.s32.totalorder %s961_s21, %s679_s29  ;;  %s684_s24 = sshll.u32 %s817_s13, 4  ;;  %s685_s24 = int_to_ptr.vmem [resolvable:$false] %s684_s24 }
  0x46   : > { %s686_s30 = scalar_lea.vmem %s685_s24, 256  ;;  %p687_p5 = scmp.lt.s32.totalorder %s961_s21, %s685_s24 }
  0x47   : > { %p682_p11 = pnand %p680_p12, %p666_p3  ;;  %p688_p9 = scmp.lt.s32.totalorder %s686_s30, %s679_s29 }
  0x49   : > { %p683_p0 = pneg %p682_p11  ;;  %p689_p1 = por %p688_p9, %p687_p5 }
  0x4b   : > { %p690_p2 = pnand %p689_p1, %p683_p0 }
  0x4d   : > { %693 = shalt.err (!%p690_p2)
}
  0x4e   : > { %570 = dma.hbm_to_vmem [thread:$0]  (!%p965_p13), %s959_s14, 128, %s961_s21, %s196_s28  }
  0x4f   : > { %p1115_p7 = scmp.ne.s32.totalorder %s1109_s27, 0 }
  0x50   : > { %s997_s6 = sand.u32 (!%p1115_p7), 1, %s796_s16   ;;  %p1116_p3 = scmp.ne.s32.totalorder (!%p1115_p7), %s1107_s25, 0 }
  0x51   : > { %216 = sbr.rel (%p1115_p7) target bundleno = 357 (0x165), region = 32  ;;  %s526_s9 = sshll.u32 (!%p1115_p7), %s997_s6, 3 }
  0x52   : > { %s219_s11 = scalar_lea.sflag (!%p1115_p7), [#allocation3], %s997_s6  ;;  %s222_s7 = scalar_lea.vmem (!%p1115_p7), [#allocation2], %s526_s9 }
  0x58   : > { %775 = dma.done.wait (%p1116_p3), %s219_s11, 128  }
  0x59   : > { %777 = vsyncadd (%p1116_p3), %s219_s11, 4294967168  ;;  %p1117_p4 = scmp.ne.s32.totalorder %s1105_s23, 0 }
  0x5b   : > { %779 = dma.done.wait (%p1117_p4), [#allocation6], 384  }
  0x5c   : > { %781 = vsyncadd (%p1117_p4), [#allocation6], 4294966912  ;;  %v818_v0 = vmov 0.0|0.0   ;;  %vm819_vm0 = vmmov 0   ;;  %v820_v1 = vmov 0.0   ;;  %v256_v2 = vld [vmem:[#allocation5] sm:$0xff] }
  0x5d   : > { %550 = vmatprep.subr.bf16.mxu0 %v818_v0  ;;  %547 = vmatprep.mubr.msk.f32.mxu0 %vm819_vm0, %v820_v1  ;;  %v257_v3 = vld [vmem:[#allocation5 + $0x8] sm:$0xff]  ;;  %v258_v5 = vld [vmem:[#allocation5 + $0x10] sm:$0xf]  ;;  %vm270_vm1 = vcmask 1043456   ;;  %vm266_vm2 = vcmask 162816   ;;  %s533_s27 = sshll.u32 %s804_s18, 7 }
  0x5e   : > { %v551_v4 = vpack.c.bf16 %v257_v3, %v256_v2  ;;  %v255_v6 = vld [vmem:[%s222_s7] sm:$0xff]  ;;  %s248_s14 = scalar_lea.vmem [#allocation7], %s526_s9  ;;  %vm345_vm3 = vcmask 523264   ;;  %s1016_s12 = scalar_lea.hbm %s1099_s3, %s533_s27 }
  0x5f   : > { %v529_v7 = vld [vmem:[%s1098_s2] ss:$0 sm:$0xff]  ;;  %s387_s21 = sshll.u32 %s248_s14, 4  ;;  %s369_s29 = scalar_lea.sflag [#allocation4], %s997_s6  ;;  %s1018_s21 = int_to_ptr.vmem [resolvable:$true] %s387_s21 }
  0x60   : > { %552 = vmatpush3.bf16.msra.mxu0 %v551_v4  ;;  %s694_s13 = scalar_lea.vmem %s1018_s21, 128  ;;  %s821_s24 = smov [#allocation7]  }
  0x61   : > { %545 = vmatprep.subr.mxu0 %v820_v1  ;;  %p695_p13 = scmp.ne.s32.totalorder %s1018_s21, %s694_s13  ;;  %s698_s30 = sshll.u32 %s821_s24, 4  ;;  %s699_s30 = int_to_ptr.vmem [resolvable:$false] %s698_s30 }
  0x62   : > { %s700_s9 = scalar_lea.vmem %s699_s30, 256  ;;  %p701_p12 = scmp.lt.s32.totalorder %s1018_s21, %s699_s30 }
  0x63   : > { %p696_p6 = pnand %p695_p13, %p944_p10  ;;  %p702_p11 = scmp.lt.s32.totalorder %s700_s9, %s694_s13 }
  0x64   : > { %546 = vmatpush3.msk.msra.mxu0 %vm270_vm1, %v258_v5 }
  0x65   : > { %548 = vmatmul.mubr.msk.f32.vlgmr.msra.gmra.mrb[0].mxu0 %vm266_vm2, %v255_v6  ;;  %p697_p8 = pneg %p696_p6  ;;  %p703_p0 = por %p702_p11, %p701_p12 }
  0x67   : > { %p704_p5 = pnand %p703_p0, %p697_p8 }
 0x138   : > { %v340_v8 = vpop.f32.mrb[0].mxu0 }
 0x139   : > { %v341_v9 = vadd.f32 %v529_v7, %v340_v8  ;;  %v549_v10 = vpop.f32.mrb[1].mxu0 }
 0x13b   : > { %v344_v11 = vmax.f32 %v341_v9, 0.0 }
 0x13d   : > { %v347_v12 = vsel %vm345_vm3, %v344_v11, -inf  ;;  %346 = vst.msk [vmem:[%s248_s14] sm:$0xff] %vm345_vm3, %v344_v11 }
 0x13e   : > { %v348_v13 = vrot.slane %v347_v12, 4 }
 0x13f   : > { %707 = shalt.err (!%p704_p5)
}
 0x140   : > { %s708_s11 = scalar_lea.hbm %s1016_s12, 128  ;;  %s712_s25 = scalar_lea.hbm %s1099_s3, 256 }
 0x141   : > { %p709_p9 = scmp.ne.s32.totalorder %s1016_s12, %s708_s11  ;;  %p713_p7 = scmp.lt.u32.totalorder %s1016_s12, %s1099_s3 }
 0x142   : > { %p714_p3 = scmp.lt.u32.totalorder %s712_s25, %s708_s11  ;;  %p716_p13 = scmp.lt.u32.totalorder %s708_s11, %s1016_s12 }
 0x143   : > { %p710_p1 = pnand %p709_p9, %p944_p10 }
 0x144   : > { %p715_p4 = por %p714_p3, %p713_p7 }
 0x145   : > { %p711_p2 = pneg %p710_p1 }
 0x146   : > { %p717_p6 = por %p716_p13, %p715_p4 }
 0x148   : > { %p718_p8 = pnand %p717_p6, %p711_p2 }
 0x14a   : > { %721 = shalt.err (!%p718_p8)
}
 0x14b   : > { %559 = dma.vmem_to_hbm [thread:$0]  (%p944_p10), %s1018_s21, 128, %s1016_s12, %s369_s29   ;;  %v349_v14 = vmax.f32 %v347_v12, %v348_v13  ;;  %vm358_vm4 = vcmask 516096  }
 0x14c   : > { %s534_s22 = sshll.u32 %s804_s18, 4  ;;  %s254_s28 = scalar_lea.vmem [#allocation8], %s997_s6 }
 0x14d   : > { %v350_v15 = vrot.slane %v349_v14, 2  ;;  %s400_s13 = sshll.u32 %s254_s28, 4  ;;  %s1047_s9 = scalar_lea.hbm %s1100_s4, %s534_s22  ;;  %s1049_s13 = int_to_ptr.vmem [resolvable:$true] %s400_s13 }
 0x14e   : > { %s374_s21 = scalar_lea.sflag [#allocation9], %s997_s6  ;;  %s722_s12 = scalar_lea.vmem %s1049_s13, 16 }
 0x14f   : > { %v351_v16 = vmax.f32 %v349_v14, %v350_v15  ;;  %p723_p12 = scmp.ne.s32.totalorder %s1049_s13, %s722_s12  ;;  %s822_s18 = smov [#allocation8]  }
 0x150   : > { %s726_s29 = sshll.u32 %s822_s18, 4  ;;  %s727_s29 = int_to_ptr.vmem [resolvable:$false] %s726_s29 }
 0x151   : > { %v352_v17 = vrot.slane %v351_v16, 1  ;;  %p724_p11 = pnand %p723_p12, %p944_p10  ;;  %s728_s11 = scalar_lea.vmem %s727_s29, 32 }
 0x152   : > { %p729_p5 = scmp.lt.s32.totalorder %s1049_s13, %s727_s29  ;;  %p730_p9 = scmp.lt.s32.totalorder %s728_s11, %s722_s12 }
 0x153   : > { %v353_v18 = vmax.f32 %v351_v16, %v352_v17  ;;  %p725_p0 = pneg %p724_p11 }
 0x154   : > { %p731_p1 = por %p730_p9, %p729_p5 }
 0x155   : > { %359 = vst.msk [vmem:[%s254_s28] sm:$0x1] %vm358_vm4, %v353_v18 }
 0x156   : > { %p732_p2 = pnand %p731_p1, %p725_p0 }
 0x158   : > { %735 = shalt.err (!%p732_p2)
}
 0x159   : > { %s736_s6 = scalar_lea.hbm %s1047_s9, 16  ;;  %s740_s25 = scalar_lea.hbm %s1100_s4, 32 }
 0x15a   : > { %p737_p7 = scmp.ne.s32.totalorder %s1047_s9, %s736_s6  ;;  %p741_p13 = scmp.lt.u32.totalorder %s1047_s9, %s1100_s4 }
 0x15b   : > { %p742_p6 = scmp.lt.u32.totalorder %s740_s25, %s736_s6  ;;  %p744_p12 = scmp.lt.u32.totalorder %s736_s6, %s1047_s9 }
 0x15c   : > { %p738_p3 = pnand %p737_p7, %p944_p10 }
 0x15d   : > { %p743_p8 = por %p742_p6, %p741_p13 }
 0x15e   : > { %p739_p4 = pneg %p738_p3 }
 0x15f   : > { %p745_p11 = por %p744_p12, %p743_p8 }
 0x161   : > { %p746_p0 = pnand %p745_p11, %p739_p4 }
 0x163   : > { %749 = shalt.err (!%p746_p0)
}
 0x164   : > { %560 = dma.vmem_to_hbm [thread:$0]  (%p944_p10), %s1049_s13, 16, %s1047_s9, %s374_s21  }
 0x165 PF: > { %s412_s22 = sand.u32 1, %s792_s15   ;;  %p1118_p5 = scmp.ne.s32.totalorder %s1108_s26, 0 }
 0x166   : > { %p1119_p9 = scmp.ge.s32.totalorder %s812_s20, 2  ;;  %s413_s28 = scalar_lea.sflag [#allocation4], %s412_s22 }
 0x168   : > { %p572_p1 = pnand %p1119_p9, %p1118_p5 }
 0x16a   : > { %783 = dma.done.wait (!%p572_p1), %s413_s28, 128  }
 0x16b   : > { %785 = vsyncadd (!%p572_p1), %s413_s28, 4294967168  ;;  %s422_s24 = scalar_lea.sflag [#allocation9], %s412_s22 }
 0x16c   : > { %787 = dma.done.wait (!%p572_p1), %s422_s24, 16  }
 0x16d   : > { %789 = vsyncadd (!%p572_p1), %s422_s24, 4294967280  ;;  %s25_s20 = sadd.s32 1, %s812_s20   ;;  %s1120_s15 = smov %s796_s16 }
 0x16e   : > { %p22_p2 = scmp.ge.s32.totalorder %s25_s20, 4   ;;  %s1121_s16 = smov %s800_s17 }
 0x16f   : > { %s1122_s17 = smov %s953_s10  ;;  %s1123_s18 = smov %s808_s19 }
 0x170   : > { %s1124_s19 = smov %s1126_s5  ;;  %24 = sbr.rel (!%p22_p2) target bundleno = 9 (0x9), region = 106 }
 0x177   :  { %426 = vsyncpa [#allocation3], 1 }
 0x178   :  { %428 = vsyncpa [#allocation3 + $0x1], 1 }
 0x179   :  { %429 = vsyncpa [#allocation6], 1 }
 0x17a   :  { %430 = vsyncpa [#allocation4], 1 }
 0x17b   :  { %432 = vsyncpa [#allocation4 + $0x1], 1 }
 0x17c   :  { %433 = vsyncpa [#allocation9], 1 }
 0x17d   :  { %435 = vsyncpa [#allocation9 + $0x1], 1 }

</bundles_post_ra>
